<compile_context>
chip_gen: v7x
topology: tpu7x:2x2x1
jax: 0.10.0
libtpu: 0.0.40
codegen_flags: <defaults>
</compile_context>

<pallas_src>
import functools

import jax
import jax.numpy as jnp
import numpy as np
from jax.experimental import pallas as pl
from jax.experimental.pallas import tpu as pltpu

IN_F = 28 * 28      # 784
IN_PAD = 896        # K padded to a multiple of 128
HID = 64
HID_PAD = 128       # hidden width padded to full lane width
OUT_F = 10
OUT_PAD = 128       # lane-dense output width


def _round_up(x, m):
    return (x + m - 1) // m * m


def _pad_to(a, shape):
    out = jnp.zeros(shape, a.dtype)
    return out.at[tuple(slice(0, s) for s in a.shape)].set(a)


def mlp_kernel(x_ref, w1_ref, b1_ref, w2_ref, b2_ref, w3_ref, b3_ref,
               w4_ref, b4_ref, o_ref):
    x = x_ref[...]                                                     # bf16 (TB, IN_PAD)

    h = jnp.dot(x, w1_ref[...], preferred_element_type=jnp.float32) + b1_ref[...]
    h = jnp.maximum(h, 0.0).astype(jnp.bfloat16)

    h = jnp.dot(h, w2_ref[...], preferred_element_type=jnp.float32) + b2_ref[...]
    h = jnp.maximum(h, 0.0).astype(jnp.bfloat16)

    h = jnp.dot(h, w3_ref[...], preferred_element_type=jnp.float32) + b3_ref[...]
    h = jnp.maximum(h, 0.0).astype(jnp.bfloat16)

    logits = jnp.dot(h, w4_ref[...], preferred_element_type=jnp.float32) + b4_ref[...]

    # log_softmax over the first OUT_F lanes only; padded lanes masked out.
    col = jax.lax.broadcasted_iota(jnp.int32, logits.shape, 1)
    valid = col < OUT_F
    masked = jnp.where(valid, logits, -1e30)
    m = jnp.max(masked, axis=1, keepdims=True)
    shifted = masked - m
    lse = jnp.log(jnp.sum(jnp.exp(shifted), axis=1, keepdims=True))
    o_ref[...] = shifted - lse                                         # padded lanes are garbage; sliced off


def prepare_params(params):
    """Pad to lane-dense widths and cast weights to bf16, biases stay f32."""
    (w1, b1), (w2, b2), (w3, b3), (w4, b4) = params
    w1p = _pad_to(w1, (IN_PAD, HID_PAD)).astype(jnp.bfloat16)
    w2p = _pad_to(w2, (HID_PAD, HID_PAD)).astype(jnp.bfloat16)
    w3p = _pad_to(w3, (HID_PAD, HID_PAD)).astype(jnp.bfloat16)
    w4p = _pad_to(w4, (HID_PAD, OUT_PAD)).astype(jnp.bfloat16)
    b1p = _pad_to(b1, (1, HID_PAD)).astype(jnp.float32)
    b2p = _pad_to(b2, (1, HID_PAD)).astype(jnp.float32)
    b3p = _pad_to(b3, (1, HID_PAD)).astype(jnp.float32)
    b4p = _pad_to(b4, (1, OUT_PAD)).astype(jnp.float32)
    return (w1p, b1p, w2p, b2p, w3p, b3p, w4p, b4p)


@functools.partial(jax.jit, static_argnames=("tb",))
def mlp_forward(x, params, tb=256):
    B = x.shape[0]
    # Shrink the batch tile for small inputs (keep a multiple of 16 for bf16
    # sublane packing); pad the batch up to a multiple of the tile.
    tb = min(tb, _round_up(B, 16))
    bp = _round_up(B, tb)
    grid = (bp // tb,)

    xp = _pad_to(x, (bp, IN_PAD)).astype(jnp.bfloat16)
    w1, b1, w2, b2, w3, b3, w4, b4 = prepare_params(params)

    def resident(arr):  # weights/biases: same block every grid step -> stay in VMEM
        return pl.BlockSpec(arr.shape, lambda i: (0,) * arr.ndim)

    out = pl.pallas_call(
        mlp_kernel,
        out_shape=jax.ShapeDtypeStruct((bp, OUT_PAD), jnp.float32),
        grid=grid,
        in_specs=[
            pl.BlockSpec((tb, IN_PAD), lambda i: (i, 0)),   # x tile, pipelined
            resident(w1), resident(b1),
            resident(w2), resident(b2),
            resident(w3), resident(b3),
            resident(w4), resident(b4),
        ],
        out_specs=pl.BlockSpec((tb, OUT_PAD), lambda i: (i, 0)),
        compiler_params=pltpu.CompilerParams(
            dimension_semantics=("parallel",)),
    )(xp, w1, b1, w2, b2, w3, b3, w4, b4)

    return out[:B, :OUT_F]


def init_linear(key, fan_in, fan_out):
    # PyTorch nn.Linear default init: U(-1/sqrt(fan_in), 1/sqrt(fan_in)),
    # stored transposed (in_features, out_features) so the kernel does x @ W + b.
    kw, kb = jax.random.split(key)
    bound = 1.0 / np.sqrt(fan_in)
    w = jax.random.uniform(kw, (fan_in, fan_out), jnp.float32, -bound, bound)
    b = jax.random.uniform(kb, (1, fan_out), jnp.float32, -bound, bound)
    return w, b


def reference_forward(x, params):
    # Mirrors the kernel's numerics: bf16 matmul inputs, f32 accumulation.
    (w1, b1), (w2, b2), (w3, b3), (w4, b4) = params

    def bdot(a, w):
        return jnp.dot(a.astype(jnp.bfloat16), w.astype(jnp.bfloat16),
                       preferred_element_type=jnp.float32)

    h = jax.nn.relu(bdot(x, w1) + b1)
    h = jax.nn.relu(bdot(h, w2) + b2)
    h = jax.nn.relu(bdot(h, w3) + b3)
    logits = bdot(h, w4) + b4
    return jax.nn.log_softmax(logits, axis=1)


if __name__ == "__main__":
    key = jax.random.PRNGKey(0)
    k_x, k1, k2, k3, k4 = jax.random.split(key, 5)

    B = 32
    x = jax.random.normal(k_x, (B, IN_F), jnp.float32)

    params = (
        init_linear(k1, IN_F, HID),
        init_linear(k2, HID, HID),
        init_linear(k3, HID, HID),
        init_linear(k4, HID, OUT_F),
    )

    out = mlp_forward(x, params)
    out = jax.block_until_ready(out)

    ref = reference_forward(x, params)
    np.testing.assert_allclose(np.asarray(out), np.asarray(ref),
                               rtol=1e-3, atol=1e-3)

    print("KERNEL_OK")
</pallas_src>

<mosaic_0001>
module attributes {stable_mosaic.version = 11 : i64} {
  func.func @mlp_kernel(%arg0: i32, %arg1: memref<32x896xbf16, #tpu.memory_space<vmem>>, %arg2: memref<896x128xbf16, #tpu.memory_space<vmem>>, %arg3: memref<1x128xf32, #tpu.memory_space<vmem>>, %arg4: memref<128x128xbf16, #tpu.memory_space<vmem>>, %arg5: memref<1x128xf32, #tpu.memory_space<vmem>>, %arg6: memref<128x128xbf16, #tpu.memory_space<vmem>>, %arg7: memref<1x128xf32, #tpu.memory_space<vmem>>, %arg8: memref<128x128xbf16, #tpu.memory_space<vmem>>, %arg9: memref<1x128xf32, #tpu.memory_space<vmem>>, %arg10: memref<32x128xf32, #tpu.memory_space<vmem>>) attributes {dimension_semantics = [#tpu.dimension_semantics<parallel>], iteration_bounds = array<i64: 1>, scalar_prefetch = 0 : i64, scratch_operands = 0 : i64, tpu.core_type = #tpu.core_type<tc>, window_params = [{transform_indices = @transform_0, window_bounds = array<i64: 32, 896>}, {pipeline_mode = #tpu.pipeline_mode<synchronous>, transform_indices = @transform_1, window_bounds = array<i64: 896, 128>}, {pipeline_mode = #tpu.pipeline_mode<synchronous>, transform_indices = @transform_2, window_bounds = array<i64: 1, 128>}, {pipeline_mode = #tpu.pipeline_mode<synchronous>, transform_indices = @transform_3, window_bounds = array<i64: 128, 128>}, {pipeline_mode = #tpu.pipeline_mode<synchronous>, transform_indices = @transform_4, window_bounds = array<i64: 1, 128>}, {pipeline_mode = #tpu.pipeline_mode<synchronous>, transform_indices = @transform_5, window_bounds = array<i64: 128, 128>}, {pipeline_mode = #tpu.pipeline_mode<synchronous>, transform_indices = @transform_6, window_bounds = array<i64: 1, 128>}, {pipeline_mode = #tpu.pipeline_mode<synchronous>, transform_indices = @transform_7, window_bounds = array<i64: 128, 128>}, {pipeline_mode = #tpu.pipeline_mode<synchronous>, transform_indices = @transform_8, window_bounds = array<i64: 1, 128>}, {transform_indices = @transform_9, window_bounds = array<i64: 32, 128>}]} {
    %c0 = arith.constant 0 : index
    %c0_0 = arith.constant 0 : index
    %0 = vector.load %arg1[%c0, %c0_0] : memref<32x896xbf16, #tpu.memory_space<vmem>>, vector<32x896xbf16>
    %c0_1 = arith.constant 0 : index
    %c0_2 = arith.constant 0 : index
    %1 = vector.load %arg2[%c0_1, %c0_2] : memref<896x128xbf16, #tpu.memory_space<vmem>>, vector<896x128xbf16>
    %cst = arith.constant dense<0.000000e+00> : vector<32x128xf32>
    %2 = tpu.matmul %0, %1, %cst {dimension_numbers = #tpu.dot_dimension_numbers<[1], [0], [0], [1], [0, 0, 1, 1], [], []>} : vector<32x896xbf16>, vector<896x128xbf16>, vector<32x128xf32> -> vector<32x128xf32>
    %c0_3 = arith.constant 0 : index
    %c0_4 = arith.constant 0 : index
    %3 = vector.load %arg3[%c0_3, %c0_4] : memref<1x128xf32, #tpu.memory_space<vmem>>, vector<1x128xf32>
    %4 = vector.broadcast %3 : vector<1x128xf32> to vector<32x128xf32>
    %5 = arith.addf %2, %4 : vector<32x128xf32>
    %cst_5 = arith.constant 0.000000e+00 : f32
    %6 = vector.broadcast %cst_5 : f32 to vector<32x128xf32>
    %7 = arith.maximumf %5, %6 : vector<32x128xf32>
    %8 = arith.truncf %7 : vector<32x128xf32> to vector<32x128xbf16>
    %c0_6 = arith.constant 0 : index
    %c0_7 = arith.constant 0 : index
    %9 = vector.load %arg4[%c0_6, %c0_7] : memref<128x128xbf16, #tpu.memory_space<vmem>>, vector<128x128xbf16>
    %cst_8 = arith.constant dense<0.000000e+00> : vector<32x128xf32>
    %10 = tpu.matmul %8, %9, %cst_8 {dimension_numbers = #tpu.dot_dimension_numbers<[1], [0], [0], [1], [0, 0, 1, 1], [], []>} : vector<32x128xbf16>, vector<128x128xbf16>, vector<32x128xf32> -> vector<32x128xf32>
    %c0_9 = arith.constant 0 : index
    %c0_10 = arith.constant 0 : index
    %11 = vector.load %arg5[%c0_9, %c0_10] : memref<1x128xf32, #tpu.memory_space<vmem>>, vector<1x128xf32>
    %12 = vector.broadcast %11 : vector<1x128xf32> to vector<32x128xf32>
    %13 = arith.addf %10, %12 : vector<32x128xf32>
    %cst_11 = arith.constant 0.000000e+00 : f32
    %14 = vector.broadcast %cst_11 : f32 to vector<32x128xf32>
    %15 = arith.maximumf %13, %14 : vector<32x128xf32>
    %16 = arith.truncf %15 : vector<32x128xf32> to vector<32x128xbf16>
    %c0_12 = arith.constant 0 : index
    %c0_13 = arith.constant 0 : index
    %17 = vector.load %arg6[%c0_12, %c0_13] : memref<128x128xbf16, #tpu.memory_space<vmem>>, vector<128x128xbf16>
    %cst_14 = arith.constant dense<0.000000e+00> : vector<32x128xf32>
    %18 = tpu.matmul %16, %17, %cst_14 {dimension_numbers = #tpu.dot_dimension_numbers<[1], [0], [0], [1], [0, 0, 1, 1], [], []>} : vector<32x128xbf16>, vector<128x128xbf16>, vector<32x128xf32> -> vector<32x128xf32>
    %c0_15 = arith.constant 0 : index
    %c0_16 = arith.constant 0 : index
    %19 = vector.load %arg7[%c0_15, %c0_16] : memref<1x128xf32, #tpu.memory_space<vmem>>, vector<1x128xf32>
    %20 = vector.broadcast %19 : vector<1x128xf32> to vector<32x128xf32>
    %21 = arith.addf %18, %20 : vector<32x128xf32>
    %cst_17 = arith.constant 0.000000e+00 : f32
    %22 = vector.broadcast %cst_17 : f32 to vector<32x128xf32>
    %23 = arith.maximumf %21, %22 : vector<32x128xf32>
    %24 = arith.truncf %23 : vector<32x128xf32> to vector<32x128xbf16>
    %c0_18 = arith.constant 0 : index
    %c0_19 = arith.constant 0 : index
    %25 = vector.load %arg8[%c0_18, %c0_19] : memref<128x128xbf16, #tpu.memory_space<vmem>>, vector<128x128xbf16>
    %cst_20 = arith.constant dense<0.000000e+00> : vector<32x128xf32>
    %26 = tpu.matmul %24, %25, %cst_20 {dimension_numbers = #tpu.dot_dimension_numbers<[1], [0], [0], [1], [0, 0, 1, 1], [], []>} : vector<32x128xbf16>, vector<128x128xbf16>, vector<32x128xf32> -> vector<32x128xf32>
    %c0_21 = arith.constant 0 : index
    %c0_22 = arith.constant 0 : index
    %27 = vector.load %arg9[%c0_21, %c0_22] : memref<1x128xf32, #tpu.memory_space<vmem>>, vector<1x128xf32>
    %28 = vector.broadcast %27 : vector<1x128xf32> to vector<32x128xf32>
    %29 = arith.addf %26, %28 : vector<32x128xf32>
    %30 = tpu.iota {dimensions = array<i32: 1>} : vector<32x128xi32>
    %c10_i32 = arith.constant 10 : i32
    %31 = vector.broadcast %c10_i32 : i32 to vector<32x128xi32>
    %32 = arith.cmpi slt, %30, %31 : vector<32x128xi32>
    %cst_23 = arith.constant -1.000000e+30 : f32
    %33 = vector.broadcast %cst_23 : f32 to vector<32x128xf32>
    %34 = arith.select %32, %29, %33 : vector<32x128xi1>, vector<32x128xf32>
    %cst_24 = arith.constant dense<0xFF800000> : vector<32xf32>
    %35 = vector.multi_reduction <maximumf>, %34, %cst_24 [1] : vector<32x128xf32> to vector<32xf32>
    %36 = vector.shape_cast %35 : vector<32xf32> to vector<32x1xf32>
    %37 = vector.broadcast %36 : vector<32x1xf32> to vector<32x128xf32>
    %38 = arith.subf %34, %37 : vector<32x128xf32>
    %39 = math.exp %38 : vector<32x128xf32>
    %cst_25 = arith.constant dense<0.000000e+00> : vector<32xf32>
    %40 = vector.multi_reduction <add>, %39, %cst_25 [1] : vector<32x128xf32> to vector<32xf32>
    %41 = vector.shape_cast %40 : vector<32xf32> to vector<32x1xf32>
    %42 = math.log %41 : vector<32x1xf32>
    %43 = vector.broadcast %42 : vector<32x1xf32> to vector<32x128xf32>
    %44 = arith.subf %38, %43 : vector<32x128xf32>
    %c0_26 = arith.constant 0 : index
    %c0_27 = arith.constant 0 : index
    %45 = vector.load %arg10[%c0_26, %c0_27] : memref<32x128xf32, #tpu.memory_space<vmem>>, vector<32x128xf32>
    tpu.vector_store %arg10[%c0_26, %c0_27], %44 {strides = array<i32>} : memref<32x128xf32, #tpu.memory_space<vmem>>, vector<32x128xf32>,
    return
  }
  func.func @transform_0(%arg0: i32) -> (i32, i32) {
    %c0_i32 = arith.constant 0 : i32
    %c0_i32_0 = arith.constant 0 : i32
    return %arg0, %c0_i32 : i32, i32
  }
  func.func @transform_1(%arg0: i32) -> (i32, i32) {
    %c0_i32 = arith.constant 0 : i32
    %c0_i32_0 = arith.constant 0 : i32
    %c0_i32_1 = arith.constant 0 : i32
    return %c0_i32, %c0_i32_0 : i32, i32
  }
  func.func @transform_2(%arg0: i32) -> (i32, i32) {
    %c0_i32 = arith.constant 0 : i32
    %c0_i32_0 = arith.constant 0 : i32
    %c0_i32_1 = arith.constant 0 : i32
    return %c0_i32, %c0_i32_0 : i32, i32
  }
  func.func @transform_3(%arg0: i32) -> (i32, i32) {
    %c0_i32 = arith.constant 0 : i32
    %c0_i32_0 = arith.constant 0 : i32
    %c0_i32_1 = arith.constant 0 : i32
    return %c0_i32, %c0_i32_0 : i32, i32
  }
  func.func @transform_4(%arg0: i32) -> (i32, i32) {
    %c0_i32 = arith.constant 0 : i32
    %c0_i32_0 = arith.constant 0 : i32
    %c0_i32_1 = arith.constant 0 : i32
    return %c0_i32, %c0_i32_0 : i32, i32
  }
  func.func @transform_5(%arg0: i32) -> (i32, i32) {
    %c0_i32 = arith.constant 0 : i32
    %c0_i32_0 = arith.constant 0 : i32
    %c0_i32_1 = arith.constant 0 : i32
    return %c0_i32, %c0_i32_0 : i32, i32
  }
  func.func @transform_6(%arg0: i32) -> (i32, i32) {
    %c0_i32 = arith.constant 0 : i32
    %c0_i32_0 = arith.constant 0 : i32
    %c0_i32_1 = arith.constant 0 : i32
    return %c0_i32, %c0_i32_0 : i32, i32
  }
  func.func @transform_7(%arg0: i32) -> (i32, i32) {
    %c0_i32 = arith.constant 0 : i32
    %c0_i32_0 = arith.constant 0 : i32
    %c0_i32_1 = arith.constant 0 : i32
    return %c0_i32, %c0_i32_0 : i32, i32
  }
  func.func @transform_8(%arg0: i32) -> (i32, i32) {
    %c0_i32 = arith.constant 0 : i32
    %c0_i32_0 = arith.constant 0 : i32
    %c0_i32_1 = arith.constant 0 : i32
    return %c0_i32, %c0_i32_0 : i32, i32
  }
  func.func @transform_9(%arg0: i32) -> (i32, i32) {
    %c0_i32 = arith.constant 0 : i32
    %c0_i32_0 = arith.constant 0 : i32
    return %arg0, %c0_i32 : i32, i32
  }
}

</mosaic_0001>

<bundles_post_ra>
// kernel: mlp_forward.1
= control target key start
LH: loop header
LB: loop body
LE: loop exit
PB: predicated region body
PF: predicated region fallthrough
CT: control target
= control target key end

     0   :  { %s1979_s1 = inlined_call_operand.vmem [shape: bf16[896,128], index: 1, kind: input, shape index: {}]   ;;  %s1980_s0 = inlined_call_operand.vmem [shape: bf16[32,896], index: 0, kind: input, shape index: {}]   ;;  %s1981_s3 = inlined_call_operand.vmem [shape: bf16[128,128], index: 3, kind: input, shape index: {}]   ;;  %s1982_s5 = inlined_call_operand.vmem [shape: bf16[128,128], index: 5, kind: input, shape index: {}]   ;;  %s1983_s2 = inlined_call_operand.vmem [shape: f32[1,128], index: 2, kind: input, shape index: {}]   ;;  %s1984_s7 = inlined_call_operand.vmem [shape: bf16[128,128], index: 7, kind: input, shape index: {}]   ;;  %s1985_s4 = inlined_call_operand.vmem [shape: f32[1,128], index: 4, kind: input, shape index: {}]   ;;  %s1986_s6 = inlined_call_operand.vmem [shape: f32[1,128], index: 6, kind: input, shape index: {}]   ;;  %s1987_s8 = inlined_call_operand.vmem [shape: f32[1,128], index: 8, kind: input, shape index: {}]   ;;  %s1988_s9 = inlined_call_operand.vmem [shape: f32[32,128], index: 9, kind: output, shape index: {}]  }
   0x1   :  { %v1507_v0 = vld [vmem:[%s1979_s1 + $0x40] sm:$0xff]   ;;  %v1511_v4 = vld [vmem:[%s1979_s1 + $0x48] sm:$0xff]   ;;  %v1515_v8 = vld [vmem:[%s1979_s1 + $0x50] sm:$0xff]  }
   0x2   :  { %v1508_v1 = vld [vmem:[%s1979_s1] sm:$0xff]   ;;  %1303 = vmatprep.subr.bf16.mxu0 %v1507_v0  ;;  %v1512_v5 = vld [vmem:[%s1979_s1 + $0x8] sm:$0xff]   ;;  %v1516_v9 = vld [vmem:[%s1979_s1 + $0x10] sm:$0xff]  }
   0x3   :  { %v1509_v2 = vld [vmem:[%s1979_s1 + $0xc0] sm:$0xff]   ;;  %1304 = vmatpush3.bf16.msra.mxu0 %v1508_v1  ;;  %v1513_v6 = vld [vmem:[%s1979_s1 + $0xc8] sm:$0xff]   ;;  %v1517_v10 = vld [vmem:[%s1979_s1 + $0xd0] sm:$0xff]  }
   0x4   :  { %v1510_v3 = vld [vmem:[%s1979_s1 + $0x80] sm:$0xff]   ;;  %1331 = vmatprep.subr.bf16.mxu1 %v1509_v2  ;;  %1305 = vmatprep.subr.bf16.mxu0 %v1511_v4  ;;  %v1514_v7 = vld [vmem:[%s1979_s1 + $0x88] sm:$0xff]   ;;  %v1518_v11 = vld [vmem:[%s1979_s1 + $0x90] sm:$0xff]  }
   0x5   :  { %1332 = vmatpush3.bf16.msra.mxu1 %v1510_v3  ;;  %v1519_v12 = vld [vmem:[%s1979_s1 + $0x58] sm:$0xff]   ;;  %v1523_v16 = vld [vmem:[%s1979_s1 + $0x60] sm:$0xff]   ;;  %v1527_v20 = vld [vmem:[%s1979_s1 + $0x68] sm:$0xff]  }
   0x6   :  { %1333 = vmatprep.subr.bf16.mxu1 %v1513_v6  ;;  %v1520_v13 = vld [vmem:[%s1979_s1 + $0x18] sm:$0xff]   ;;  %v1524_v17 = vld [vmem:[%s1979_s1 + $0x20] sm:$0xff]   ;;  %v1528_v21 = vld [vmem:[%s1979_s1 + $0x28] sm:$0xff]  }
   0x7   :  { %1306 = vmatpush3.bf16.msra.mxu0 %v1512_v5  ;;  %v1521_v14 = vld [vmem:[%s1979_s1 + $0xd8] sm:$0xff]   ;;  %v1525_v18 = vld [vmem:[%s1979_s1 + $0xe0] sm:$0xff]   ;;  %v1529_v22 = vld [vmem:[%s1979_s1 + $0xe8] sm:$0xff]  }
   0x8   :  { %1307 = vmatprep.subr.bf16.mxu0 %v1515_v8  ;;  %v1522_v15 = vld [vmem:[%s1979_s1 + $0x98] sm:$0xff]   ;;  %v1526_v19 = vld [vmem:[%s1979_s1 + $0xa0] sm:$0xff]   ;;  %v1530_v23 = vld [vmem:[%s1979_s1 + $0xa8] sm:$0xff]  }
   0x9   :  { %1334 = vmatpush3.bf16.msra.mxu1 %v1514_v7  ;;  %v1531_v24 = vld [vmem:[%s1979_s1 + $0x70] sm:$0xff]   ;;  %v1535_v28 = vld [vmem:[%s1979_s1 + $0x78] sm:$0xff]   ;;  %v1540_v32 = vld [vmem:[%s1980_s0 + $0x4] ss:$28 sps:$4 sm:$0xff]  }
   0xa   :  { %1335 = vmatprep.subr.bf16.mxu1 %v1517_v10  ;;  %v1532_v25 = vld [vmem:[%s1979_s1 + $0x30] sm:$0xff]   ;;  %v1536_v29 = vld [vmem:[%s1979_s1 + $0x38] sm:$0xff]   ;;  %608 = vmatprep.mubr.bf16.mxu0 %v1540_v32  ;;  %v1542_v34 = vld [vmem:[%s1979_s1 + $0x140] sm:$0xff]  }
   0xb   :  { %1308 = vmatpush3.bf16.msra.mxu0 %v1516_v9  ;;  %v1533_v26 = vld [vmem:[%s1979_s1 + $0xf0] sm:$0xff]   ;;  %v1537_v30 = vld [vmem:[%s1979_s1 + $0xf8] sm:$0xff]   ;;  %v1543_v35 = vld [vmem:[%s1980_s0 + $0x8] ss:$28 sps:$4 sm:$0xff]  }
   0xc   :  { %1309 = vmatprep.subr.bf16.mxu0 %v1519_v12  ;;  %v1534_v27 = vld [vmem:[%s1979_s1 + $0xb0] sm:$0xff]   ;;  %v1538_v31 = vld [vmem:[%s1980_s0] ss:$28 sps:$4 sm:$0xff]   ;;  %v1545_v36 = vld [vmem:[%s1980_s0 + $0xc] ss:$28 sps:$4 sm:$0xff]  }
   0xd   :  { %1336 = vmatpush3.bf16.msra.mxu1 %v1518_v11  ;;  %v1541_v33 = vld [vmem:[%s1979_s1 + $0xb8] sm:$0xff]   ;;  %v1546_v37 = vld [vmem:[%s1979_s1 + $0x100] sm:$0xff]   ;;  %657 = vmatprep.mubr.bf16.mxu1 %v1545_v36  ;;  %v1547_v38 = vld [vmem:[%s1979_s1 + $0x148] sm:$0xff]  }
   0xe   :  { %1337 = vmatprep.subr.bf16.mxu1 %v1521_v14  ;;  %v1548_v39 = vld [vmem:[%s1979_s1 + $0x180] sm:$0xff]   ;;  %v1549_v40 = vld [vmem:[%s1979_s1 + $0x108] sm:$0xff]   ;;  %v1550_v41 = vld [vmem:[%s1979_s1 + $0x150] sm:$0xff]  }
   0xf   :  { %1310 = vmatpush3.bf16.msra.mxu0 %v1520_v13  ;;  %v1551_v42 = vld [vmem:[%s1979_s1 + $0x188] sm:$0xff]   ;;  %v1552_v43 = vld [vmem:[%s1979_s1 + $0x110] sm:$0xff]   ;;  %v1553_v44 = vld [vmem:[%s1979_s1 + $0x158] sm:$0xff]  }
  0x10   :  { %1311 = vmatprep.subr.bf16.mxu0 %v1523_v16  ;;  %v1554_v45 = vld [vmem:[%s1979_s1 + $0x190] sm:$0xff]   ;;  %v1555_v46 = vld [vmem:[%s1979_s1 + $0x118] sm:$0xff]   ;;  %v1556_v47 = vld [vmem:[%s1979_s1 + $0x160] sm:$0xff]  }
  0x11   :  { %1338 = vmatpush3.bf16.msra.mxu1 %v1522_v15  ;;  %v1557_v48 = vld [vmem:[%s1979_s1 + $0x198] sm:$0xff]   ;;  %v1558_v49 = vld [vmem:[%s1979_s1 + $0x120] sm:$0xff]   ;;  %v1561_v51 = vld [vmem:[%s1979_s1 + $0x168] sm:$0xff]  }
  0x12   :  { %1339 = vmatprep.subr.bf16.mxu1 %v1525_v18  ;;  %v1559_v50 = vld [vmem:[%s1980_s0 + $0x3c] ss:$28 sps:$4 sm:$0xff]   ;;  %v1562_v52 = vld [vmem:[%s1979_s1 + $0x1a0] sm:$0xff]   ;;  %v1564_v54 = vld [vmem:[%s1979_s1 + $0x128] sm:$0xff]  }
  0x13   :  { %1312 = vmatpush3.bf16.msra.mxu0 %v1524_v17  ;;  %v1563_v53 = vld [vmem:[%s1980_s0 + $0x38] ss:$28 sps:$4 sm:$0xff]   ;;  %v1565_v55 = vld [vmem:[%s1980_s0 + $0x44] ss:$28 sps:$4 sm:$0xff]   ;;  %v1569_v58 = vld [vmem:[%s1979_s1 + $0x1a8] sm:$0xff]  }
  0x14   :  { %1313 = vmatprep.subr.bf16.mxu0 %v1527_v20  ;;  %v1567_v56 = vld [vmem:[%s1980_s0 + $0x40] ss:$28 sps:$4 sm:$0xff]   ;;  %v1568_v57 = vld [vmem:[%s1979_s1 + $0x170] sm:$0xff]   ;;  %v1580_v3 = vld [vmem:[%s1980_s0 + $0x4c] ss:$28 sps:$4 sm:$0xff]  }
  0x15   :  { %1340 = vmatpush3.bf16.msra.mxu1 %v1526_v19  ;;  %v1570_v59 = vld [vmem:[%s1979_s1 + $0x130] sm:$0xff]   ;;  %v1571_v60 = vld [vmem:[%s1979_s1 + $0x178] sm:$0xff]   ;;  %v1582_v5 = vld [vmem:[%s1980_s0 + $0x48] ss:$28 sps:$4 sm:$0xff]  }
  0x16   :  { %1341 = vmatprep.subr.bf16.mxu1 %v1529_v22  ;;  %v1572_v61 = vld [vmem:[%s1979_s1 + $0x1b0] sm:$0xff]   ;;  %v1573_v62 = vld [vmem:[%s1979_s1 + $0x138] sm:$0xff]   ;;  %v1583_v6 = vld [vmem:[%s1981_s3] sm:$0xff]  }
  0x17   :  { %1314 = vmatpush3.bf16.msra.mxu0 %v1528_v21  ;;  %v1576_v63 = vld [vmem:[%s1980_s0 + $0x14] ss:$28 sps:$4 sm:$0xff]   ;;  %v1577_v0 = vld [vmem:[%s1979_s1 + $0x1b8] sm:$0xff]   ;;  %v1584_v7 = vld [vmem:[%s1981_s3 + $0x8] sm:$0xff]  }
  0x18   :  { %1315 = vmatprep.subr.bf16.mxu0 %v1531_v24  ;;  %v1578_v1 = vld [vmem:[%s1980_s0 + $0x18] ss:$28 sps:$4 sm:$0xff]   ;;  %v1574_v2 = vld [vmem:[%s1980_s0 + $0x10] ss:$28 sps:$4 sm:$0xff]   ;;  %v1587_v10 = vld [vmem:[%s1981_s3 + $0x20] sm:$0xff]  }
  0x19   :  { %1342 = vmatpush3.bf16.msra.mxu1 %v1530_v23  ;;  %v1579_v4 = vld [vmem:[%s1980_s0 + $0x50] ss:$28 sps:$4 sm:$0xff]   ;;  %v1586_v9 = vld [vmem:[%s1981_s3 + $0x18] sm:$0xff]   ;;  %v1591_v14 = vld [vmem:[%s1982_s5] sm:$0xff]  }
  0x1a   :  { %1343 = vmatprep.subr.bf16.mxu1 %v1533_v26  ;;  %v1585_v8 = vld [vmem:[%s1981_s3 + $0x10] sm:$0xff]   ;;  %v1588_v11 = vld [vmem:[%s1981_s3 + $0x28] sm:$0xff]   ;;  %v1590_v13 = vld [vmem:[%s1981_s3 + $0x38] sm:$0xff]  }
  0x1b   :  { %1316 = vmatpush3.bf16.msra.mxu0 %v1532_v25  ;;  %v1589_v12 = vld [vmem:[%s1981_s3 + $0x30] sm:$0xff]   ;;  %v1592_v15 = vld [vmem:[%s1982_s5 + $0x8] sm:$0xff]   ;;  %v1594_v17 = vld [vmem:[%s1982_s5 + $0x18] sm:$0xff]  }
  0x1c   :  { %1317 = vmatprep.subr.bf16.mxu0 %v1535_v28  ;;  %v1593_v16 = vld [vmem:[%s1982_s5 + $0x10] sm:$0xff]   ;;  %v1595_v18 = vld [vmem:[%s1982_s5 + $0x20] sm:$0xff]   ;;  %v1596_v19 = vld [vmem:[%s1982_s5 + $0x28] sm:$0xff]  }
  0x1d   :  { %1344 = vmatpush3.bf16.msra.mxu1 %v1534_v27  ;;  %v1205_v21 = vld [vmem:[%s1983_s2] ss:$0 sm:$0xff] }
  0x1e   :  { %1345 = vmatprep.subr.bf16.mxu1 %v1537_v30 }
  0x1f   :  { %1318 = vmatpush3.bf16.msra.mxu0 %v1536_v29 }
  0x20   :  { %1359 = vmatprep.subr.bf16.mxu0 %v1542_v34 }
  0x21   :  { %1346 = vmatpush3.bf16.msra.mxu1 %v1541_v33 }
  0x22   :  { %609 = vmatmul.mubr.bf16.vlgmr.msra.gmra.mrb[0].mxu0 %v1538_v31  ;;  %1427 = vmatprep.subr.bf16.mxu1 %v1548_v39 }
  0x23   :  { %1360 = vmatpush3.bf16.msra.mxu0 %v1546_v37  ;;  %616 = vmatprep.mubr.bf16.mxu0 %v1559_v50 }
  0x24   :  { %658 = vmatmul.mubr.bf16.vlgmr.msra.gmra.mrb[0].mxu1 %v1543_v35  ;;  %1361 = vmatprep.subr.bf16.mxu0 %v1547_v38 }
  0x25   :  { %1428 = vmatpush3.bf16.msra.mxu1 %v1548_v39  ;;  %665 = vmatprep.mubr.bf16.mxu1 %v1565_v55 }
  0x26   :  { %1429 = vmatprep.subr.bf16.mxu1 %v1551_v42 }
  0x27   :  { %1362 = vmatpush3.bf16.msra.mxu0 %v1549_v40 }
  0x28   :  { %1363 = vmatprep.subr.bf16.mxu0 %v1550_v41 }
  0x29   :  { %1430 = vmatpush3.bf16.msra.mxu1 %v1551_v42 }
  0x2a   :  { %1431 = vmatprep.subr.bf16.mxu1 %v1554_v45  ;;  %617 = vmatmul.mubr.bf16.gmra.mrb[4].mxu0 %v1563_v53 }
  0x2b   :  { %1364 = vmatpush3.bf16.msra.mxu0 %v1552_v43  ;;  %706 = vmatprep.mubr.bf16.mxu0 %v1576_v63 }
  0x2c   :  { %1365 = vmatprep.subr.bf16.mxu0 %v1553_v44  ;;  %666 = vmatmul.mubr.bf16.gmra.mrb[4].mxu1 %v1567_v56 }
  0x2d   :  { %1432 = vmatpush3.bf16.msra.mxu1 %v1554_v45  ;;  %1443 = vmatprep.mubr.bf16.mxu1 %v1578_v1 }
  0x2e   :  { %1433 = vmatprep.subr.bf16.mxu1 %v1557_v48 }
  0x2f   :  { %1366 = vmatpush3.bf16.msra.mxu0 %v1555_v46 }
  0x30   :  { %1367 = vmatprep.subr.bf16.mxu0 %v1556_v47 }
  0x31   :  { %1434 = vmatpush3.bf16.msra.mxu1 %v1557_v48 }
  0x32   :  { %1435 = vmatprep.subr.bf16.mxu1 %v1562_v52 }
  0x33   :  { %1368 = vmatpush3.bf16.msra.mxu0 %v1558_v49 }
  0x34   :  { %1369 = vmatprep.subr.bf16.mxu0 %v1561_v51 }
  0x35   :  { %1436 = vmatpush3.bf16.msra.mxu1 %v1562_v52 }
  0x36   :  { %1437 = vmatprep.subr.bf16.mxu1 %v1569_v58 }
  0x37   :  { %1370 = vmatpush3.bf16.msra.mxu0 %v1564_v54 }
  0x38   :  { %1371 = vmatprep.subr.bf16.mxu0 %v1568_v57 }
  0x39   :  { %1438 = vmatpush3.bf16.msra.mxu1 %v1569_v58 }
  0x3a   :  { %1439 = vmatprep.subr.bf16.mxu1 %v1572_v61 }
  0x3b   :  { %1372 = vmatpush3.bf16.msra.mxu0 %v1570_v59 }
  0x3c   :  { %1373 = vmatprep.subr.bf16.mxu0 %v1571_v60 }
  0x3d   :  { %1440 = vmatpush3.bf16.msra.mxu1 %v1572_v61 }
  0x3e   :  { %1441 = vmatprep.subr.bf16.mxu1 %v1577_v0 }
  0x3f   :  { %1374 = vmatpush3.bf16.msra.mxu0 %v1573_v62 }
  0x40   :  { %1447 = vmatprep.subr.bf16.mxu0 %v1583_v6 }
  0x41   :  { %1442 = vmatpush3.bf16.msra.mxu1 %v1577_v0 }
  0x42   :  { %707 = vmatmul.mubr.bf16.vlgmr.msra.gmra.mrb[8].mxu0 %v1574_v2  ;;  %1467 = vmatprep.subr.bf16.mxu1 %v1591_v14 }
  0x43   :  { %714 = vmatprep.mubr.bf16.mxu0 %v1580_v3  ;;  %1448 = vmatpush3.bf16.msra.mxu0 %v1583_v6 }
  0x44   :  { %1444 = vmatmul.mubr.bf16.vlgmr.msra.gmra.mrb[8].mxu1 %v1579_v4  ;;  %1449 = vmatprep.subr.bf16.mxu0 %v1584_v7 }
  0x45   :  { %1468 = vmatpush3.bf16.msra.mxu1 %v1591_v14 }
  0x46   :  { %1469 = vmatprep.subr.bf16.mxu1 %v1592_v15 }
  0x47   :  { %1450 = vmatpush3.bf16.msra.mxu0 %v1584_v7 }
  0x48   :  { %1451 = vmatprep.subr.bf16.mxu0 %v1585_v8 }
  0x49   :  { %1470 = vmatpush3.bf16.msra.mxu1 %v1592_v15 }
  0x4a   :  { %715 = vmatmul.mubr.bf16.gmra.mrb[12].mxu0 %v1582_v5  ;;  %1471 = vmatprep.subr.bf16.mxu1 %v1593_v16 }
  0x4b   :  { %1452 = vmatpush3.bf16.msra.mxu0 %v1585_v8 }
  0x4c   :  { %1453 = vmatprep.subr.bf16.mxu0 %v1586_v9 }
  0x4d   :  { %1472 = vmatpush3.bf16.msra.mxu1 %v1593_v16 }
  0x4e   :  { %1473 = vmatprep.subr.bf16.mxu1 %v1594_v17 }
  0x4f   :  { %1454 = vmatpush3.bf16.msra.mxu0 %v1586_v9 }
  0x50   :  { %1455 = vmatprep.subr.bf16.mxu0 %v1587_v10 }
  0x51   :  { %1474 = vmatpush3.bf16.msra.mxu1 %v1594_v17 }
  0x52   :  { %1475 = vmatprep.subr.bf16.mxu1 %v1595_v18 }
  0x53   :  { %1456 = vmatpush3.bf16.msra.mxu0 %v1587_v10 }
  0x54   :  { %1457 = vmatprep.subr.bf16.mxu0 %v1588_v11 }
  0x55   :  { %1476 = vmatpush3.bf16.msra.mxu1 %v1595_v18 }
  0x56   :  { %1477 = vmatprep.subr.bf16.mxu1 %v1596_v19 }
  0x57   :  { %1458 = vmatpush3.bf16.msra.mxu0 %v1588_v11 }
  0x58   :  { %1459 = vmatprep.subr.bf16.mxu0 %v1589_v12 }
  0x59   :  { %1478 = vmatpush3.bf16.msra.mxu1 %v1596_v19  ;;  %v1597_v19 = vld [vmem:[%s1982_s5 + $0x30] sm:$0xff]  }
  0x5a   :  { %1479 = vmatprep.subr.bf16.mxu1 %v1597_v19 }
  0x5b   :  { %1460 = vmatpush3.bf16.msra.mxu0 %v1589_v12 }
  0x5c   :  { %1461 = vmatprep.subr.bf16.mxu0 %v1590_v13 }
  0x5d   :  { %1480 = vmatpush3.bf16.msra.mxu1 %v1597_v19 }
  0x5f   :  { %1462 = vmatpush3.bf16.msra.mxu0 %v1590_v13 }
  0xf5   :  { %v1319_v20 = vpop.f32.mrb[0].mxu0 }
  0xf6   :  { %v1320_v22 = vpop.f32.mrb[1].mxu0 }
  0xf7   :  { %v1321_v23 = vadd.f32 %v1320_v22, %v1319_v20  ;;  %v1322_v24 = vpop.f32.mrb[2].mxu0  ;;  %v1347_v25 = vpop.f32.mrb[0].mxu1  ;;  %v1598_v20 = vld [vmem:[%s1982_s5 + $0x38] sm:$0xff]   ;;  %v1600_v22 = vld [vmem:[%s1984_s7 + $0x8] sm:$0xff]  }
  0xf8   :  { %v1323_v26 = vpop.f32.mrb[3].mxu0  ;;  %v1348_v29 = vpop.f32.mrb[1].mxu1  ;;  %1481 = vmatprep.subr.bf16.mxu1 %v1598_v20 }
  0xf9   :  { %v611_v27 = vadd.f32 %v1321_v23, %v1205_v21  ;;  %v1324_v28 = vadd.f32 %v1323_v26, %v1322_v24  ;;  %v1349_v30 = vadd.f32 %v1348_v29, %v1347_v25  ;;  %v1350_v31 = vpop.f32.mrb[2].mxu1  ;;  %1482 = vmatpush3.bf16.msra.mxu1 %v1598_v20  ;;  %v1601_v23 = vld [vmem:[%s1984_s7 + $0x10] sm:$0xff]   ;;  %v1602_v24 = vld [vmem:[%s1984_s7 + $0x18] sm:$0xff]   ;;  %v1603_v25 = vld [vmem:[%s1984_s7 + $0x20] sm:$0xff]  }
  0xfa   :  { %v1351_v33 = vpop.f32.mrb[3].mxu1  ;;  %v1604_v26 = vld [vmem:[%s1984_s7 + $0x28] sm:$0xff]  }
  0xfb   :  { %v614_v32 = vadd.f32 %v1324_v28, %v1205_v21  ;;  %v660_v34 = vadd.f32 %v1349_v30, %v611_v27  ;;  %v1352_v35 = vadd.f32 %v1351_v33, %v1350_v31  ;;  %v1276_v27 = vld [vmem:[%s1985_s4] ss:$0 sm:$0xff] }
  0xfd   :  { %v663_v36 = vadd.f32 %v1352_v35, %v614_v32  ;;  %v1325_v37 = vpop.f32.mrb[4].mxu0 }
  0xfe   :  { %v1326_v38 = vpop.f32.mrb[5].mxu0 }
  0xff   :  { %v1327_v39 = vadd.f32 %v1326_v38, %v1325_v37  ;;  %v1328_v40 = vpop.f32.mrb[6].mxu0  ;;  %v1353_v41 = vpop.f32.mrb[4].mxu1 }
 0x100   :  { %v1329_v42 = vpop.f32.mrb[7].mxu0  ;;  %v1354_v45 = vpop.f32.mrb[5].mxu1 }
 0x101   :  { %v619_v43 = vadd.f32 %v1327_v39, %v1205_v21  ;;  %v1330_v44 = vadd.f32 %v1329_v42, %v1328_v40  ;;  %v1355_v46 = vadd.f32 %v1354_v45, %v1353_v41  ;;  %v1356_v47 = vpop.f32.mrb[6].mxu1  ;;  %v1605_v42 = vld [vmem:[%s1984_s7 + $0x30] sm:$0xff]  }
 0x102   :  { %v1357_v49 = vpop.f32.mrb[7].mxu1 }
 0x103   :  { %v622_v48 = vadd.f32 %v1330_v44, %v1205_v21  ;;  %v668_v50 = vadd.f32 %v1355_v46, %v619_v43  ;;  %v1358_v51 = vadd.f32 %v1357_v49, %v1356_v47  ;;  %v1599_v21 = vld [vmem:[%s1984_s7] sm:$0xff]   ;;  %v1606_v43 = vld [vmem:[%s1984_s7 + $0x38] sm:$0xff]  }
 0x104   :  { %1487 = vmatprep.subr.bf16.mxu0 %v1599_v21  ;;  %v1285_v44 = vld [vmem:[%s1986_s6] ss:$0 sm:$0xff] }
 0x105   :  { %v671_v52 = vadd.f32 %v1358_v51, %v622_v48 }
 0x115   :  { %v1375_v53 = vpop.f32.mrb[8].mxu0 }
 0x116   :  { %v1376_v54 = vpop.f32.mrb[9].mxu0 }
 0x117   :  { %v1377_v55 = vadd.f32 %v1376_v54, %v1375_v53  ;;  %v1378_v56 = vpop.f32.mrb[10].mxu0  ;;  %v1445_v58 = vpop.f32.mrb[8].mxu1 }
 0x118   :  { %v1379_v57 = vpop.f32.mrb[11].mxu0  ;;  %v757_v61 = vpop.f32.mrb[9].mxu1 }
 0x119   :  { %v1380_v59 = vadd.f32 %v1379_v57, %v1378_v56  ;;  %v709_v60 = vadd.f32 %v1377_v55, %v660_v34  ;;  %v1446_v62 = vpop.f32.mrb[10].mxu1 }
 0x11a   :  { %v760_v1 = vpop.f32.mrb[11].mxu1 }
 0x11b   :  { %v758_v63 = vadd.f32 %v757_v61, %v709_v60  ;;  %v712_v0 = vadd.f32 %v1380_v59, %v663_v36  ;;  %v1150_v59 = vlaneseq  ;;  %v1294_v61 = vld [vmem:[%s1987_s8] ss:$0 sm:$0xff] }
 0x11d   :  { %v761_v2 = vadd.f32 %v760_v1, %v712_v0  ;;  %v1381_v3 = vpop.f32.mrb[12].mxu0  ;;  %v772_v5 = vmax.f32 %v758_v63, 0.0  ;;  %v1151_v60 = vand.u32 127, %v1150_v59 }
 0x11e   :  { %v1382_v4 = vpop.f32.mrb[13].mxu0 }
 0x11f   :  { %v773_v6 = vmax.f32 %v761_v2, 0.0  ;;  %v1383_v7 = vadd.f32 %v1382_v4, %v1381_v3  ;;  %v1384_v8 = vpop.f32.mrb[14].mxu0  ;;  %vm1152_vm0 = vcmp.lt.s32.totalorder %v1151_v60, 10 }
 0x120   :  { %v1385_v9 = vpop.f32.mrb[15].mxu0 }
 0x121   :  { %v776_v10 = vpack.c.bf16 %v773_v6, %v772_v5  ;;  %v717_v11 = vadd.f32 %v1383_v7, %v668_v50  ;;  %v1386_v12 = vadd.f32 %v1385_v9, %v1384_v8 }
 0x123   :  { %v766_v13 = vadd.f32 %v1445_v58, %v717_v11  ;;  %v720_v14 = vadd.f32 %v1386_v12, %v671_v52  ;;  %1463 = vmatprep.mubr.bf16.mxu0 %v776_v10 }
 0x125   :  { %v769_v15 = vadd.f32 %v1446_v62, %v720_v14  ;;  %v774_v16 = vmax.f32 %v766_v13, 0.0 }
 0x127   :  { %v775_v17 = vmax.f32 %v769_v15, 0.0 }
 0x129   :  { %v777_v18 = vpack.c.bf16 %v775_v17, %v774_v16 }
 0x12b   :  { %1464 = vmatmul.mubr.bf16.vlgmr.msra.gmra.mrb[16].mxu0 %v777_v18 }
 0x12c   :  { %1488 = vmatpush3.bf16.msra.mxu0 %v1599_v21 }
 0x12d   :  { %1489 = vmatprep.subr.bf16.mxu0 %v1600_v22 }
 0x130   :  { %1490 = vmatpush3.bf16.msra.mxu0 %v1600_v22 }
 0x131   :  { %1491 = vmatprep.subr.bf16.mxu0 %v1601_v23 }
 0x134   :  { %1492 = vmatpush3.bf16.msra.mxu0 %v1601_v23 }
 0x135   :  { %1493 = vmatprep.subr.bf16.mxu0 %v1602_v24 }
 0x138   :  { %1494 = vmatpush3.bf16.msra.mxu0 %v1602_v24 }
 0x139   :  { %1495 = vmatprep.subr.bf16.mxu0 %v1603_v25 }
 0x13c   :  { %1496 = vmatpush3.bf16.msra.mxu0 %v1603_v25 }
 0x13d   :  { %1497 = vmatprep.subr.bf16.mxu0 %v1604_v26 }
 0x140   :  { %1498 = vmatpush3.bf16.msra.mxu0 %v1604_v26 }
 0x141   :  { %1499 = vmatprep.subr.bf16.mxu0 %v1605_v42 }
 0x144   :  { %1500 = vmatpush3.bf16.msra.mxu0 %v1605_v42 }
 0x145   :  { %1501 = vmatprep.subr.bf16.mxu0 %v1606_v43 }
 0x148   :  { %1502 = vmatpush3.bf16.msra.mxu0 %v1606_v43 }
 0x1fe   :  { %v1465_v28 = vpop.f32.mrb[16].mxu0 }
 0x1ff   :  { %v892_v29 = vadd.f32 %v1465_v28, %v1276_v27  ;;  %v883_v30 = vpop.f32.mrb[17].mxu0 }
 0x200   :  { %v884_v31 = vadd.f32 %v1276_v27, %v883_v30  ;;  %v1466_v32 = vpop.f32.mrb[18].mxu0 }
 0x201   :  { %v895_v33 = vadd.f32 %v1466_v32, %v1276_v27  ;;  %v886_v34 = vpop.f32.mrb[19].mxu0  ;;  %v900_v36 = vmax.f32 %v892_v29, 0.0 }
 0x202   :  { %v887_v35 = vadd.f32 %v1276_v27, %v886_v34  ;;  %v898_v38 = vmax.f32 %v884_v31, 0.0 }
 0x203   :  { %v901_v37 = vmax.f32 %v895_v33, 0.0 }
 0x204   :  { %v899_v39 = vmax.f32 %v887_v35, 0.0 }
 0x205   :  { %v903_v40 = vpack.c.bf16 %v901_v37, %v900_v36 }
 0x206   :  { %v902_v41 = vpack.c.bf16 %v899_v39, %v898_v38 }
 0x208   :  { %1483 = vmatprep.mubr.bf16.mxu1 %v902_v41 }
 0x209   :  { %1484 = vmatmul.mubr.bf16.vlgmr.msra.gmra.mrb[12].mxu1 %v903_v40 }
 0x2dc   :  { %v1485_v45 = vpop.f32.mrb[12].mxu1 }
 0x2dd   :  { %v1018_v46 = vadd.f32 %v1485_v45, %v1285_v44  ;;  %v1009_v47 = vpop.f32.mrb[13].mxu1 }
 0x2de   :  { %v1010_v48 = vadd.f32 %v1285_v44, %v1009_v47  ;;  %v1486_v49 = vpop.f32.mrb[14].mxu1 }
 0x2df   :  { %v1021_v50 = vadd.f32 %v1486_v49, %v1285_v44  ;;  %v1012_v51 = vpop.f32.mrb[15].mxu1  ;;  %v1026_v53 = vmax.f32 %v1018_v46, 0.0 }
 0x2e0   :  { %v1013_v52 = vadd.f32 %v1285_v44, %v1012_v51  ;;  %v1024_v55 = vmax.f32 %v1010_v48, 0.0 }
 0x2e1   :  { %v1027_v54 = vmax.f32 %v1021_v50, 0.0 }
 0x2e2   :  { %v1025_v56 = vmax.f32 %v1013_v52, 0.0 }
 0x2e3   :  { %v1029_v57 = vpack.c.bf16 %v1027_v54, %v1026_v53 }
 0x2e4   :  { %v1028_v58 = vpack.c.bf16 %v1025_v56, %v1024_v55 }
 0x2e6   :  { %1503 = vmatprep.mubr.bf16.mxu0 %v1028_v58 }
 0x2e7   :  { %1504 = vmatmul.mubr.bf16.vlgmr.msra.gmra.mrb[20].mxu0 %v1029_v57 }
 0x3ba   :  { %v1505_v62 = vpop.f32.mrb[20].mxu0 }
 0x3bb   :  { %v1144_v63 = vadd.f32 %v1505_v62, %v1294_v61  ;;  %v1135_v0 = vpop.f32.mrb[21].mxu0 }
 0x3bc   :  { %v1136_v1 = vadd.f32 %v1294_v61, %v1135_v0  ;;  %v1506_v2 = vpop.f32.mrb[22].mxu0 }
 0x3bd   :  { %v1147_v3 = vadd.f32 %v1506_v2, %v1294_v61  ;;  %v1138_v4 = vpop.f32.mrb[23].mxu0  ;;  %v1155_v5 = vsel %vm1152_vm0, %v1144_v63, -1e+30 }
 0x3be   :  { %v1139_v6 = vadd.f32 %v1294_v61, %v1138_v4  ;;  %1161 = vmax.xlane.f32.xlu1 %v1155_v5  ;;  %v1153_v7 = vsel %vm1152_vm0, %v1136_v1, -1e+30 }
 0x3bf   :  { %1157 = vmax.xlane.f32.xlu0 %v1153_v7  ;;  %v1156_v8 = vsel %vm1152_vm0, %v1147_v3, -1e+30 }
 0x3c0   :  { %v1154_v9 = vsel %vm1152_vm0, %v1139_v6, -1e+30 }
 0x3c2   :  { %1163 = vmax.xlane.f32.xlu1 %v1156_v8 }
 0x3c3   :  { %1159 = vmax.xlane.f32.xlu0 %v1154_v9 }
 0x44b   :  { %v1162_v10 = vpop.xlane.xlu1 %1161 }
 0x44c   :  { %v1167_v11 = vsub.f32 %v1155_v5, %v1162_v10  ;;  %v1158_v12 = vpop.xlane.xlu0 %1157 }
 0x44d   :  { %v1165_v13 = vsub.f32 %v1153_v7, %v1158_v12 }
 0x44e   :  { %v1173_v16 = vmul.f32 1.442695, %v1167_v11 }
 0x44f   :  { %v1169_v14 = vmul.f32 1.442695, %v1165_v13  ;;  %v1164_v15 = vpop.xlane.xlu1 %1163 }
 0x450   :  { %v1160_v17 = vpop.xlane.xlu0 %1159  ;;  %v1168_v18 = vsub.f32 %v1156_v8, %v1164_v15 }
 0x451   :  { %1607 = vpow2.f32 %v1169_v14  ;;  %v1166_v19 = vsub.f32 %v1154_v9, %v1160_v17 }
 0x452   :  { %1609 = vpow2.f32 %v1173_v16  ;;  %v1175_v21 = vmul.f32 1.442695, %v1168_v18 }
 0x453   :  { %v1171_v20 = vmul.f32 1.442695, %v1166_v19 }
 0x455   :  { %1611 = vpow2.f32 %v1171_v20 }
 0x456   :  { %1613 = vpow2.f32 %v1175_v21 }
 0x45b   :  { %v1608_v22 = vpop.eup %1607 }
 0x45c   :  { %1177 = vadd.xlane.f32.xlu0 %v1608_v22  ;;  %v1610_v23 = vpop.eup %1609 }
 0x45f   :  { %v1612_v24 = vpop.eup %1611 }
 0x460   :  { %1181 = vadd.xlane.f32.xlu0 %v1610_v23  ;;  %1179 = vadd.xlane.f32.xlu1 %v1612_v24  ;;  %v1614_v25 = vpop.eup %1613 }
 0x464   :  { %1183 = vadd.xlane.f32.xlu1 %v1614_v25 }
 0x4e9   :  { %v1178_v26 = vpop.xlane.xlu0 %1177 }
 0x4ea   :  { %1615 = vlog2.f32 %v1178_v26 }
 0x4ed   :  { %v1180_v27 = vpop.xlane.xlu1 %1179  ;;  %v1182_v28 = vpop.xlane.xlu0 %1181 }
 0x4ee   :  { %1617 = vlog2.f32 %v1180_v27 }
 0x4ef   :  { %1619 = vlog2.f32 %v1182_v28 }
 0x4f1   :  { %v1184_v29 = vpop.xlane.xlu1 %1183 }
 0x4f2   :  { %1621 = vlog2.f32 %v1184_v29 }
 0x4f4   :  { %v1616_v30 = vpop.eup %1615 }
 0x4f5   :  { %v1186_v31 = vmul.f32 0.6931472, %v1616_v30 }
 0x4f7   :  { %v1193_v32 = vsub.f32 %v1165_v13, %v1186_v31 }
 0x4f8   :  { %v1618_v33 = vpop.eup %1617 }
 0x4f9   :  { %v1620_v34 = vpop.eup %1619  ;;  %1197 = vst [vmem:[%s1988_s9] sm:$0xff] %v1193_v32  ;;  %v1188_v35 = vmul.f32 0.6931472, %v1618_v33 }
 0x4fa   :  { %v1190_v36 = vmul.f32 0.6931472, %v1620_v34 }
 0x4fb   :  { %v1194_v37 = vsub.f32 %v1166_v19, %v1188_v35 }
 0x4fc   :  { %v1622_v38 = vpop.eup %1621  ;;  %v1195_v39 = vsub.f32 %v1167_v11, %v1190_v36 }
 0x4fd   :  { %1198 = vst [vmem:[%s1988_s9 + $0x8] sm:$0xff] %v1194_v37  ;;  %v1192_v40 = vmul.f32 0.6931472, %v1622_v38 }
 0x4fe   :  { %1199 = vst [vmem:[%s1988_s9 + $0x10] sm:$0xff] %v1195_v39 }
 0x4ff   :  { %v1196_v41 = vsub.f32 %v1168_v18, %v1192_v40 }
 0x501   :  { %1200 = vst [vmem:[%s1988_s9 + $0x18] sm:$0xff] %v1196_v41 }

</bundles_post_ra>
